<compile_context>
chip_gen: v6e
topology: v6e:2x2x1
jax: 0.10.0
libtpu: 0.0.40
codegen_flags: <defaults>
</compile_context>

<pallas_src>
import math

import jax
import jax.numpy as jnp
from jax.experimental import pallas as pl
from jax.experimental.pallas import tpu as pltpu


# ----------------------------------------------------------------------------
# Tiling helpers
# ----------------------------------------------------------------------------
def _round_up(x, m):
    return (x + m - 1) // m * m


def _largest_tile(total, cap, quantum):
    """Largest multiple of `quantum` that divides `total` and is <= cap."""
    best = quantum
    t = quantum
    limit = min(cap, total)
    while t <= limit:
        if total % t == 0:
            best = t
        t += quantum
    return best


def _vmem_budget():
    """Generation-aware scoped-VMEM budget for the main grid."""
    try:
        phys = pltpu.get_tpu_info().vmem_capacity_bytes
    except Exception:  # unknown backend -> assume the smallest (v7x) VMEM
        phys = 64 * 1024 * 1024
    if phys >= 100 * 1024 * 1024:      # v5e / v6e: 128 MiB physical
        return 80 * 1024 * 1024
    return 40 * 1024 * 1024            # v7x: 64 MiB physical


def _pick_batch_tile(B, compute_dtype):
    """Batch padding + batch tile.  bt == b_pad whenever B <= 512 so the
    weight matrix is streamed from HBM exactly once in pass B."""
    quantum = 16 if jnp.dtype(compute_dtype) == jnp.dtype(jnp.bfloat16) else 8
    b_pad = _round_up(max(B, 1), quantum)
    if b_pad <= 512:
        return b_pad, b_pad
    bt = 512                            # multiple of 256: fills v6e/v7x MXU
    return _round_up(b_pad, bt), bt


def _pick_class_tile(C, max_ct):
    """Pick a lane-dense class tile ct (multiple of 128) and c_pad (multiple
    of ct).  Prefers large tiles (big DMAs, few grid steps) while limiting
    padding waste and keeping >=2 class tiles when possible (v7x 2 TCs)."""
    c128 = _round_up(max(C, 1), 128)
    max_ct = max(128, (min(max_ct, c128) // 128) * 128)
    best = None
    for ct in range(128, max_ct + 1, 128):
        c_pad = _round_up(c128, ct)
        n_tiles = c_pad // ct
        # padded columns streamed/written  +  fixed per-grid-step overhead
        cost = c_pad + 192 * n_tiles
        if n_tiles == 1:
            cost += 128                 # mild penalty: second v7x TC idles
        if best is None or cost < best[0] or (cost == best[0] and ct > best[1]):
            best = (cost, ct, c_pad)
    return best[1], best[2]


def _pad2(x, rows, cols):
    r, c = x.shape
    if r == rows and c == cols:
        return x
    return jnp.pad(x, ((0, rows - r), (0, cols - c)))


# ----------------------------------------------------------------------------
# Pass F (and optional pass W): row-wise L2 normalization
# ----------------------------------------------------------------------------
def _normalize_rows_kernel(x_ref, o_ref):
    x = x_ref[...].astype(jnp.float32)
    ssq = jnp.sum(x * x, axis=-1, keepdims=True)
    # x / max(||x||, 1e-12)  ==  x * rsqrt(max(||x||^2, 1e-24))  (EUP rsqrt)
    inv = jax.lax.rsqrt(jnp.maximum(ssq, 1e-24))
    o_ref[...] = (x * inv).astype(o_ref.dtype)


def _l2_normalize_rows(x, out_dtype, row_tile):
    rows, d = x.shape
    return pl.pallas_call(
        _normalize_rows_kernel,
        out_shape=jax.ShapeDtypeStruct((rows, d), out_dtype),
        grid=(rows // row_tile,),
        in_specs=[pl.BlockSpec((row_tile, d), lambda i: (i, 0))],
        out_specs=pl.BlockSpec((row_tile, d), lambda i: (i, 0)),
        compiler_params=pltpu.CompilerParams(dimension_semantics=("parallel",)),
    )(x)


# ----------------------------------------------------------------------------
# Pass A: pipelined target-row gather + per-row margin scalars + t update
# ----------------------------------------------------------------------------
def _target_prepass_kernel(b_real, b_pad, cos_m, sin_m, threshold, mm,
                           compute_dtype):
    def kernel(tgt_ref, t_ref, fn_ref, w_hbm, cosm_ref, ftl_ref, tnew_ref,
               gbuf, sem):
        # Gather the raw weight row of every sample's target class.  All the
        # tiny (1, D) copies are issued back-to-back on one DMA semaphore so
        # their latencies overlap, then drained in order (same-size waits).
        # TODO(synk): chunk the gather + fn buffer for extremely large batches.
        @pl.loop(0, b_pad)
        def _(i):
            row = tgt_ref[i]
            pltpu.make_async_copy(w_hbm.at[pl.ds(row, 1), :],
                                  gbuf.at[pl.ds(i, 1), :],
                                  sem.at[0]).start()

        @pl.loop(0, b_pad)
        def _(i):
            pltpu.make_async_copy(w_hbm.at[pl.ds(0, 1), :],
                                  gbuf.at[pl.ds(i, 1), :],
                                  sem.at[0]).wait()

        # Normalize the B gathered rows locally (O(B*D), a handful of vregs),
        # cast to the MXU operand dtype so numerics track pass B, then a
        # VPU row-wise dot for target_logit.
        w = gbuf[...].astype(jnp.float32)
        winv = jax.lax.rsqrt(jnp.maximum(jnp.sum(w * w, axis=-1, keepdims=True),
                                         1e-24))
        wn = (w * winv).astype(compute_dtype).astype(jnp.float32)
        fn = fn_ref[...].astype(jnp.float32)

        tl = jnp.sum(fn * wn, axis=-1, keepdims=True)          # (b_pad, 1)
        tl = jnp.clip(tl, -1.0, 1.0)
        sin_theta = jnp.sqrt(jnp.maximum(1.0 - tl * tl, 0.0))
        cos_theta_m = tl * cos_m - sin_theta * sin_m
        ftl = jnp.where(tl > threshold, cos_theta_m, tl - mm)

        # Running stat over the *real* rows only (padded rows excluded).
        row_id = jax.lax.broadcasted_iota(jnp.int32, tl.shape, 0)
        tl_sum = jnp.sum(jnp.where(row_id < b_real, tl, 0.0))
        t_new = tl_sum * (0.01 / b_real) + 0.99 * t_ref[0]

        cosm_ref[...] = cos_theta_m
        ftl_ref[...] = ftl
        tnew_ref[0] = t_new

    return kernel


# ----------------------------------------------------------------------------
# Pass B: main tiled matmul (+ optional fused weight-norm) + ArcFace transform
# ----------------------------------------------------------------------------
def _normalize_weight_tile(w_ref, fuse_wnorm, compute_dtype):
    if fuse_wnorm:
        w = w_ref[...].astype(jnp.float32)
        inv = jax.lax.rsqrt(jnp.maximum(jnp.sum(w * w, axis=-1, keepdims=True),
                                        1e-24))
        return (w * inv).astype(compute_dtype)
    return w_ref[...]


def _cosine_kernel(scale, fuse_wnorm, compute_dtype):
    def kernel(fn_ref, w_ref, out_ref):
        wn = _normalize_weight_tile(w_ref, fuse_wnorm, compute_dtype)
        cos = jax.lax.dot_general(
            fn_ref[...], wn,
            dimension_numbers=(((1,), (1,)), ((), ())),   # fn @ wn^T, no XLU .T
            preferred_element_type=jnp.float32)
        out_ref[...] = jnp.clip(cos, -1.0, 1.0) * scale
    return kernel


def _margin_kernel(scale, c_tile, fuse_wnorm, compute_dtype):
    def kernel(fn_ref, w_ref, tgt_ref, cosm_ref, ftl_ref, t_ref, out_ref):
        wn = _normalize_weight_tile(w_ref, fuse_wnorm, compute_dtype)
        cos = jax.lax.dot_general(
            fn_ref[...], wn,
            dimension_numbers=(((1,), (1,)), ((), ())),
            preferred_element_type=jnp.float32)
        cos = jnp.clip(cos, -1.0, 1.0)                       # (bt, ct)

        bt, ct = cos.shape
        # Per-row (bt,1) subtract instead of a full-tile iota add.
        loc_tgt = tgt_ref[...] - pl.program_id(1) * c_tile   # (bt, 1)
        col = jax.lax.broadcasted_iota(jnp.int32, (bt, ct), 1)
        onehot = col == loc_tgt

        t_new = t_ref[0]                                     # SMEM scalar
        mask = cos > cosm_ref[...]                           # (bt,1) broadcast
        out = jnp.where(mask, cos * (t_new + cos), cos)      # hard examples
        out = jnp.where(onehot, ftl_ref[...], out)           # scatter_ target col
        out_ref[...] = out * scale
    return kernel


# ----------------------------------------------------------------------------
# Wrapper
# ----------------------------------------------------------------------------
def arcface_forward(features, weight, targets=None, t=None, scale=128.0,
                    margin=0.15, compute_dtype=jnp.bfloat16):
    """Functional equivalent of Arcface.forward.

    features: [B, in_feat] f32, weight: [num_classes, in_feat] f32,
    targets: optional [B] int, t: optional [1] f32 running buffer.
    Returns logits [B, num_classes] (and updated t when targets is given).
    `compute_dtype` is the MXU operand dtype (bf16 default, f32 accumulation).
    """
    features = jnp.asarray(features, jnp.float32)
    weight = jnp.asarray(weight, jnp.float32)
    B, D = features.shape
    C, D2 = weight.shape
    assert D == D2

    cos_m = math.cos(margin)
    sin_m = math.sin(margin)
    threshold = math.cos(math.pi - margin)
    mm = math.sin(math.pi - margin) * margin

    itemsize = jnp.dtype(compute_dtype).itemsize
    budget = _vmem_budget()

    # --- tiling --------------------------------------------------------------
    b_pad, bt = _pick_batch_tile(B, compute_dtype)
    b_tiles = b_pad // bt
    fuse_wnorm = (b_tiles == 1)          # weights streamed exactly once
    w_in_bytes = 4 if fuse_wnorm else itemsize

    fixed = 2 * bt * D * itemsize + 8 * bt * 4 + (1 << 16)
    per_col = 2 * (D * w_in_bytes + bt * 4)
    max_ct = max(128, min(2048, ((budget - fixed) // per_col // 128) * 128))
    ct, c_pad = _pick_class_tile(C, max_ct)

    feats_p = _pad2(features, b_pad, D)
    w_p = _pad2(weight, c_pad, D)

    # --- pass F: feature normalization (tiny) ---------------------------------
    fn = _l2_normalize_rows(feats_p, compute_dtype, bt)

    # --- weight stream: fused normalization (1 i-tile) or separate pass -------
    if fuse_wnorm:
        w_stream = w_p                   # raw f32; normalized inside pass B
    else:
        norm_cap = (budget // (2 * max(D, 1) * (4 + itemsize)) // 128) * 128
        w_norm_tile = _largest_tile(c_pad, max(128, min(1024, norm_cap)), 128)
        w_stream = _l2_normalize_rows(w_p, compute_dtype, w_norm_tile)

    # --- main-grid compiler params / cost estimate ----------------------------
    est_vmem = (2 * bt * D * itemsize            # fn tile (double-buffered)
                + 2 * ct * D * w_in_bytes        # weight tile
                + 2 * bt * ct * 4                # f32 output tile
                + 8 * bt * 4)                    # per-row scalars
    cp_kwargs = dict(dimension_semantics=("parallel", "parallel"))
    if est_vmem > 12 * 1024 * 1024:
        cp_kwargs["vmem_limit_bytes"] = int(budget)
    cparams = pltpu.CompilerParams(**cp_kwargs)
    cost = pl.CostEstimate(
        flops=2 * b_pad * c_pad * D,
        transcendentals=0,
        bytes_accessed=int(b_pad * D * itemsize
                           + b_tiles * c_pad * D * w_in_bytes
                           + b_pad * c_pad * 4))

    grid = (b_tiles, c_pad // ct)
    fn_spec = pl.BlockSpec((bt, D), lambda i, j: (i, 0))
    w_spec = pl.BlockSpec((ct, D), lambda i, j: (j, 0))
    out_spec = pl.BlockSpec((bt, ct), lambda i, j: (i, j))
    row_spec = pl.BlockSpec((bt, 1), lambda i, j: (i, 0))

    # --- inference path --------------------------------------------------------
    if targets is None:
        logits = pl.pallas_call(
            _cosine_kernel(float(scale), fuse_wnorm, compute_dtype),
            out_shape=jax.ShapeDtypeStruct((b_pad, c_pad), jnp.float32),
            grid=grid,
            in_specs=[fn_spec, w_spec],
            out_specs=out_spec,
            compiler_params=cparams,
            cost_estimate=cost,
        )(fn, w_stream)
        return logits[:B, :C]

    # --- training path ----------------------------------------------------------
    if t is None:
        t = jnp.zeros((1,), jnp.float32)
    t_arr = jnp.asarray(t, jnp.float32).reshape(1)
    tgt_pad = jnp.pad(jnp.asarray(targets, jnp.int32).reshape(-1),
                      (0, b_pad - B))

    # Pass A: pipelined gather + per-row margin scalars + t update.
    cosm, ftl, t_new = pl.pallas_call(
        _target_prepass_kernel(B, b_pad, cos_m, sin_m, threshold, mm,
                               compute_dtype),
        out_shape=(
            jax.ShapeDtypeStruct((b_pad, 1), jnp.float32),   # cos_theta_m
            jax.ShapeDtypeStruct((b_pad, 1), jnp.float32),   # final_target_logit
            jax.ShapeDtypeStruct((1,), jnp.float32),         # updated t
        ),
        in_specs=[
            pl.BlockSpec(memory_space=pltpu.MemorySpace.SMEM),  # targets
            pl.BlockSpec(memory_space=pltpu.MemorySpace.SMEM),  # t
            pl.BlockSpec(memory_space=pltpu.MemorySpace.VMEM),  # fn
            pl.BlockSpec(memory_space=pl.ANY),                  # raw W in HBM
        ],
        out_specs=(
            pl.BlockSpec(memory_space=pltpu.MemorySpace.VMEM),
            pl.BlockSpec(memory_space=pltpu.MemorySpace.VMEM),
            pl.BlockSpec(memory_space=pltpu.MemorySpace.SMEM),
        ),
        scratch_shapes=[pltpu.VMEM((b_pad, D), jnp.float32),
                        pltpu.SemaphoreType.DMA((1,))],
    )(tgt_pad, t_arr, fn, w_p)

    # Pass B: tiled matmul + margin / hard-example transform.
    tgt2d = tgt_pad.reshape(b_pad, 1)
    logits = pl.pallas_call(
        _margin_kernel(float(scale), ct, fuse_wnorm, compute_dtype),
        out_shape=jax.ShapeDtypeStruct((b_pad, c_pad), jnp.float32),
        grid=grid,
        in_specs=[fn_spec, w_spec, row_spec, row_spec, row_spec,
                  pl.BlockSpec(memory_space=pltpu.MemorySpace.SMEM)],
        out_specs=out_spec,
        compiler_params=cparams,
        cost_estimate=cost,
    )(fn, w_stream, tgt2d, cosm, ftl, t_new)

    return logits[:B, :C], t_new


# ----------------------------------------------------------------------------
# Pure-JAX reference (mirrors the PyTorch forward; F.normalize == x*rsqrt(..))
# ----------------------------------------------------------------------------
def _l2n_ref(x):
    ssq = jnp.sum(x * x, axis=-1, keepdims=True)
    return x * jax.lax.rsqrt(jnp.maximum(ssq, 1e-24))


def _arcface_ref(features, weight, targets, t, scale=128.0, margin=0.15,
                 compute_dtype=jnp.float32):
    cos_m = math.cos(margin)
    sin_m = math.sin(margin)
    threshold = math.cos(math.pi - margin)
    mm = math.sin(math.pi - margin) * margin

    fn = _l2n_ref(features).astype(compute_dtype)
    wn = _l2n_ref(weight).astype(compute_dtype)
    cos = jax.lax.dot_general(fn, wn, (((1,), (1,)), ((), ())),
                              preferred_element_type=jnp.float32)
    cos = jnp.clip(cos, -1.0, 1.0)
    if targets is None:
        return cos * scale
    B = features.shape[0]
    target_logit = cos[jnp.arange(B), targets].reshape(-1, 1)
    sin_theta = jnp.sqrt(1.0 - target_logit ** 2)
    cos_theta_m = target_logit * cos_m - sin_theta * sin_m
    mask = cos > cos_theta_m
    final_target_logit = jnp.where(target_logit > threshold, cos_theta_m,
                                   target_logit - mm)
    t_new = target_logit.mean() * 0.01 + 0.99 * t[0]
    out = jnp.where(mask, cos * (t_new + cos), cos)
    onehot = jax.nn.one_hot(targets, cos.shape[1], dtype=bool)
    out = jnp.where(onehot, final_target_logit, out)
    return out * scale, t_new.reshape(1), cos, cos_theta_m


# ----------------------------------------------------------------------------
# Demo / self-check
# ----------------------------------------------------------------------------
if __name__ == "__main__":
    B, IN_FEAT, NUM_CLASSES = 12, 64, 2500
    SCALE, MARGIN = 128.0, 0.15

    key = jax.random.PRNGKey(0)
    kf, kw, kt = jax.random.split(key, 3)
    features = jax.random.normal(kf, (B, IN_FEAT), jnp.float32)
    weight = jax.random.normal(kw, (NUM_CLASSES, IN_FEAT), jnp.float32) * 0.1
    targets = jax.random.randint(kt, (B,), 0, NUM_CLASSES, jnp.int32)
    t0 = jnp.zeros((1,), jnp.float32)

    def run_and_check(compute_dtype, atol_logits, boundary_tol, atol_t):
        # Inference path (targets=None).
        logits_inf = jax.block_until_ready(
            arcface_forward(features, weight, None, None, SCALE, MARGIN,
                            compute_dtype))
        ref_inf = _arcface_ref(features, weight, None, t0, SCALE, MARGIN,
                               compute_dtype)
        assert logits_inf.shape == (B, NUM_CLASSES)
        assert bool(jnp.all(jnp.isfinite(logits_inf)))
        max_d = float(jnp.max(jnp.abs(logits_inf - ref_inf)))
        assert max_d <= atol_logits, ("inference mismatch", max_d)

        # Training path (targets + running-stat t update).
        logits, new_t = arcface_forward(features, weight, targets, t0, SCALE,
                                        MARGIN, compute_dtype)
        logits = jax.block_until_ready(logits)
        new_t = jax.block_until_ready(new_t)
        ref_logits, ref_t, cos_ref, cosm_ref = _arcface_ref(
            features, weight, targets, t0, SCALE, MARGIN, compute_dtype)
        assert logits.shape == (B, NUM_CLASSES)
        assert bool(jnp.all(jnp.isfinite(logits)))
        # The hard-example mask (cos > cos_theta_m) is a step discontinuity;
        # compare only elements a safe numerical distance from the boundary.
        stable = jnp.abs(cos_ref - cosm_ref) > boundary_tol
        max_d = float(jnp.max(jnp.where(stable,
                                        jnp.abs(logits - ref_logits), 0.0)))
        assert max_d <= atol_logits, ("training mismatch", max_d)
        assert bool(jnp.allclose(new_t, ref_t, atol=atol_t, rtol=0)), (
            float(new_t[0]), float(ref_t[0]))

    # f32 MXU operands: tight-ish check.
    run_and_check(jnp.float32, atol_logits=0.5, boundary_tol=2e-3, atol_t=1e-5)
    # bf16 MXU operands (default, recommended on v5e/v6e/v7x): looser check.
    run_and_check(jnp.bfloat16, atol_logits=2.5, boundary_tol=1e-2, atol_t=1e-4)

    print("KERNEL_OK")
</pallas_src>

<mosaic_0001>
module attributes {stable_mosaic.version = 11 : i64} {
  func.func @_normalize_rows_kernel(%arg0: i32, %arg1: memref<16x64xf32, #tpu.memory_space<vmem>>, %arg2: memref<16x64xf32, #tpu.memory_space<vmem>>) attributes {dimension_semantics = [#tpu.dimension_semantics<parallel>], iteration_bounds = array<i64: 1>, scalar_prefetch = 0 : i64, scratch_operands = 0 : i64, tpu.core_type = #tpu.core_type<tc>, window_params = [{transform_indices = @transform_0, window_bounds = array<i64: 16, 64>}, {transform_indices = @transform_1, window_bounds = array<i64: 16, 64>}]} {
    %c0 = arith.constant 0 : index
    %c0_0 = arith.constant 0 : index
    %0 = vector.load %arg1[%c0, %c0_0] : memref<16x64xf32, #tpu.memory_space<vmem>>, vector<16x64xf32>
    %1 = arith.mulf %0, %0 : vector<16x64xf32>
    %cst = arith.constant dense<0.000000e+00> : vector<16xf32>
    %2 = vector.multi_reduction <add>, %1, %cst [1] : vector<16x64xf32> to vector<16xf32>
    %3 = vector.shape_cast %2 : vector<16xf32> to vector<16x1xf32>
    %cst_1 = arith.constant 1.000000e-24 : f32
    %4 = vector.broadcast %cst_1 : f32 to vector<16x1xf32>
    %5 = arith.maximumf %3, %4 : vector<16x1xf32>
    %6 = math.rsqrt %5 : vector<16x1xf32>
    %7 = vector.broadcast %6 : vector<16x1xf32> to vector<16x64xf32>
    %8 = arith.mulf %0, %7 : vector<16x64xf32>
    %c0_2 = arith.constant 0 : index
    %c0_3 = arith.constant 0 : index
    %9 = vector.load %arg2[%c0_2, %c0_3] : memref<16x64xf32, #tpu.memory_space<vmem>>, vector<16x64xf32>
    tpu.vector_store %arg2[%c0_2, %c0_3], %8 {strides = array<i32>} : memref<16x64xf32, #tpu.memory_space<vmem>>, vector<16x64xf32>,
    return
  }
  func.func @transform_0(%arg0: i32) -> (i32, i32) {
    %c0_i32 = arith.constant 0 : i32
    %c0_i32_0 = arith.constant 0 : i32
    return %arg0, %c0_i32 : i32, i32
  }
  func.func @transform_1(%arg0: i32) -> (i32, i32) {
    %c0_i32 = arith.constant 0 : i32
    %c0_i32_0 = arith.constant 0 : i32
    return %arg0, %c0_i32 : i32, i32
  }
}

</mosaic_0001>

<bundles_post_ra>
// kernel: tpu_custom_call.1
= control target key start
LH: loop header
LB: loop body
LE: loop exit
PB: predicated region body
PF: predicated region fallthrough
CT: control target
= control target key end

     0   :  { %6 = vsyncpa [#allocation3], 0  ;;  %s141_s0 = inlined_call_operand.hbm [shape: f32[16,64], index: 0, kind: input, shape index: {}]   ;;  %s142_s1 = inlined_call_operand.hbm [shape: f32[16,64], index: 1, kind: output, shape index: {}]  }
   0x1   :  { %7 = vsyncpa [#allocation4], 0  ;;  %s111_s6 = smov [#allocation2]  }
   0x2   :  { %s13_s7 = sshll.u32 %s111_s6, 4  ;;  %s14_s7 = int_to_ptr.vmem [resolvable:$true] %s13_s7 }
   0x3   :  { %s75_s8 = scalar_lea.vmem %s14_s7, 256  ;;  %p80_p1 = scmp.lt.s32.totalorder %s14_s7, %s14_s7 }
   0x4   :  { %p76_p0 = scmp.ne.s32.totalorder %s14_s7, %s75_s8  ;;  %p81_p2 = scmp.lt.s32.totalorder %s75_s8, %s75_s8 }
   0x6   :  { %p82_p3 = por %p81_p2, %p80_p1 }
   0x8   :  { %p83_p4 = pnand %p82_p3, %p76_p0 }
   0xa   :  { %86 = shalt.err (!%p83_p4)
}
   0xb   :  { %s112_s9 = smov 128   ;;  %s113_s10 = smov 8  }
   0xc   :  { %19 = dma.hbm_to_vmem [thread:$0]  %s141_s0, 256, %s14_s7, [#allocation3], %s112_s9, %s112_s9, %s113_s10  }
   0xd   :  { %107 = dma.done.wait [#allocation3], 256  }
   0xe   :  { %108 = vsyncadd [#allocation3], 4294967040  ;;  %v23_v0 = vld [vmem:[#allocation2] sm:$0xff]  ;;  %vm27_vm0 = vcmask 523264   ;;  %v24_v1 = vld [vmem:[#allocation2 + $0x8] sm:$0xff]  ;;  %s114_s0 = smov [#allocation5]  }
   0xf   :  { %v25_v2 = vmul.f32 %v23_v0, %v23_v0  ;;  %v26_v3 = vmul.f32 %v24_v1, %v24_v1  ;;  %s47_s13 = sshll.u32 %s114_s0, 4  ;;  %s48_s13 = int_to_ptr.vmem [resolvable:$true] %s47_s13 }
  0x10   :  { %s87_s14 = scalar_lea.vmem %s48_s13, 256  ;;  %p92_p6 = scmp.lt.s32.totalorder %s48_s13, %s48_s13 }
  0x11   :  { %v28_v4 = vsel %vm27_vm0, %v25_v2, 0.0  ;;  %v31_v5 = vsel %vm27_vm0, %v26_v3, 0.0  ;;  %p88_p5 = scmp.ne.s32.totalorder %s48_s13, %s87_s14  ;;  %p93_p7 = scmp.lt.s32.totalorder %s87_s14, %s87_s14 }
  0x12   :  { %29 = vadd.xlane.f32.xlu0 %v28_v4 }
  0x13   :  { %p94_p8 = por %p93_p7, %p92_p6 }
  0x15   :  { %p95_p9 = pnand %p94_p8, %p88_p5 }
  0x16   :  { %32 = vadd.xlane.f32.xlu0 %v31_v5 }
  0x9b   :  { %v30_v6 = vpop.xlane.xlu0 %29 }
  0x9c   :  { %v34_v7 = vmax.f32 %v30_v6, 1e-24 }
  0x9e   :  { %63 = vrsqrt.f32 %v34_v7 }
  0x9f   :  { %v33_v8 = vpop.xlane.xlu0 %32 }
  0xa0   :  { %v35_v9 = vmax.f32 %v33_v8, 1e-24 }
  0xa2   :  { %65 = vrsqrt.f32 %v35_v9 }
  0xab   :  { %v64_v10 = vpop.eup %63 }
  0xac   :  { %v38_v11 = vmul.f32 %v64_v10, %v23_v0 }
  0xae   :  { %40 = vst.msk [vmem:[#allocation5] sm:$0xff] %vm27_vm0, %v38_v11 }
  0xaf   :  { %v66_v12 = vpop.eup %65 }
  0xb0   :  { %v39_v13 = vmul.f32 %v66_v12, %v24_v1 }
  0xb2   :  { %41 = vst.msk [vmem:[#allocation5 + $0x8] sm:$0xff] %vm27_vm0, %v39_v13 }
  0xb3   :  { %98 = shalt.err (!%p95_p9)
}
  0xb4   :  { %53 = dma.vmem_to_hbm [thread:$0]  %s48_s13, 256, %s142_s1, [#allocation4], %s112_s9, %s112_s9, %s113_s10  }
  0xb5   :  { %109 = dma.done.wait [#allocation4], 256  }
  0xb6   :  { %110 = vsyncadd [#allocation4], 4294967040 }
  0xb7   :  { %57 = vsyncpa [#allocation3], 1 }
  0xb8   :  { %58 = vsyncpa [#allocation4], 1 }

</bundles_post_ra>
